<compile_context>
chip_gen: v5e
topology: v5e:2x2
jax: 0.10.0
libtpu: 0.0.40
codegen_flags: <defaults>
</compile_context>

<pallas_src>
import functools

import jax
import jax.numpy as jnp
from jax import lax
from jax.experimental import pallas as pl
from jax.experimental.pallas import tpu as pltpu

EPS = 1e-5


# ----------------------------- Pallas kernel ------------------------------- #
def _eigen_kernel(x_ref, w1_ref, b1_ref, w2_ref, b2_ref,
                  ew1_ref, eb1_ref, ew2_ref, eb2_ref, out_ref,
                  *, n_modes, batch, n_nodes, latent, edge_hidden):
    N, L, EH, B = n_nodes, latent, edge_hidden, batch
    SLAB = n_modes * B * N

    # ---- encoder (node_func) for ALL modes & batches: two fused MXU matmuls ----
    x = x_ref[...]                                                    # (B*N, T)
    h = jnp.tanh(jnp.dot(x, w1_ref[...],
                         preferred_element_type=jnp.float32) + b1_ref[...])  # (B*N, nm*H1)
    y = jnp.dot(h, w2_ref[...],
                preferred_element_type=jnp.float32) + b2_ref[...]     # (B*N, nm*L)

    # ---- pearson statistics: mean/std batched over all B*N rows per mode ----
    cov_tiles = []
    denom_tiles = []
    for m in range(n_modes):
        y_m = y[:, m * L:(m + 1) * L]                                 # (B*N, L)
        mean = jnp.mean(y_m, axis=-1, keepdims=True)                  # (B*N, 1)
        a = y_m - mean
        # torch.std default: unbiased (divide by L-1)
        s = jnp.sqrt(jnp.sum(a * a, axis=-1, keepdims=True) / (L - 1))  # (B*N, 1)
        s_row = jnp.transpose(s)                                      # (1, B*N)
        for b in range(B):
            a_b = a[b * N:(b + 1) * N, :]                             # (N, L)
            # a_b @ a_b.T without materializing a transpose (contract last dims)
            cov_tiles.append(lax.dot_general(
                a_b, a_b, (((1,), (1,)), ((), ())),
                preferred_element_type=jnp.float32))                  # (N, N)
            denom_tiles.append(
                s[b * N:(b + 1) * N, :] * s_row[:, b * N:(b + 1) * N])  # (N, N) outer prod

    # ---- lane-dense slab: all (mode,batch) corr tiles side by side -> one vreg ----
    cov_slab = jnp.concatenate(cov_tiles, axis=1) / float(L - 1)      # (N, SLAB)
    denom_slab = jnp.concatenate(denom_tiles, axis=1) + EPS           # (N, SLAB)
    corr_slab = cov_slab * pl.reciprocal(denom_slab)                  # exact reciprocal (EUP)
    # (no diagonal zeroing: diagonal never reaches the triu(k=1) output)

    # ---- edge_func (1 -> EH -> 1) fused over the slab: EH dense tanh/FMA passes ----
    acc = jnp.zeros((N, SLAB), jnp.float32) + eb2_ref[...]            # (N, SLAB)
    for c in range(EH):
        acc = acc + ew2_ref[c:c + 1, :] * jnp.tanh(
            corr_slab * ew1_ref[c:c + 1, :] + eb1_ref[c:c + 1, :])

    out_ref[...] = acc


# ------------------------------ wrapper ------------------------------------ #
def eigen_function_nn_forward(x, params):
    """x: (B, N, T) float32.  Returns U: (B, E, n_modes), E = N*(N-1)//2."""
    W1, B1, W2, B2, EW1, EB1, EW2, EB2 = params
    B, N, T = x.shape
    n_modes, _, H1 = W1.shape
    L = W2.shape[-1]
    EH = EW1.shape[-1]
    BN = B * N
    SLAB = n_modes * B * N

    # --- pack encoder weights so all modes run in two matmuls (n_modes*H1 <= MXU tile) ---
    W1cat = jnp.transpose(W1, (1, 0, 2)).reshape(T, n_modes * H1)     # (T, nm*H1)
    B1cat = B1.reshape(1, n_modes * H1)
    W2bd = jnp.zeros((n_modes * H1, n_modes * L), jnp.float32)        # block-diagonal layer 2
    for m in range(n_modes):
        W2bd = W2bd.at[m * H1:(m + 1) * H1, m * L:(m + 1) * L].set(W2[m])
    B2cat = B2.reshape(1, n_modes * L)
    x2d = x.reshape(BN, T)

    # --- lane-broadcast edge-MLP weights: lane block (m*B+b)*N..+N carries mode m's scalars ---
    mode_of_lane = jnp.repeat(jnp.arange(n_modes), B * N)             # (SLAB,)
    ew1_slab = jnp.take(EW1, mode_of_lane, axis=0).T                  # (EH, SLAB)
    eb1_slab = jnp.take(EB1, mode_of_lane, axis=0).T                  # (EH, SLAB)
    ew2_slab = jnp.take(EW2, mode_of_lane, axis=0).T                  # (EH, SLAB)
    eb2_slab = EB2[mode_of_lane][None, :]                             # (1, SLAB)

    kernel = functools.partial(
        _eigen_kernel, n_modes=n_modes, batch=B, n_nodes=N, latent=L, edge_hidden=EH)

    edge_slab = pl.pallas_call(
        kernel,
        out_shape=jax.ShapeDtypeStruct((N, SLAB), jnp.float32),
        grid_spec=pltpu.PrefetchScalarGridSpec(
            num_scalar_prefetch=0,
            grid=(1,),                                                # single step: no pipeline overhead
            in_specs=[
                pl.BlockSpec((BN, T), lambda i: (0, 0)),                        # x (B*N, T)
                pl.BlockSpec((T, n_modes * H1), lambda i: (0, 0)),              # W1cat
                pl.BlockSpec((1, n_modes * H1), lambda i: (0, 0)),              # B1cat
                pl.BlockSpec((n_modes * H1, n_modes * L), lambda i: (0, 0)),    # W2 block-diag
                pl.BlockSpec((1, n_modes * L), lambda i: (0, 0)),               # B2cat
                pl.BlockSpec((EH, SLAB), lambda i: (0, 0)),                     # edge W1 lane-bcast
                pl.BlockSpec((EH, SLAB), lambda i: (0, 0)),                     # edge B1 lane-bcast
                pl.BlockSpec((EH, SLAB), lambda i: (0, 0)),                     # edge W2 lane-bcast
                pl.BlockSpec((1, SLAB), lambda i: (0, 0)),                      # edge B2 lane-bcast
            ],
            out_specs=pl.BlockSpec((N, SLAB), lambda i: (0, 0)),                # lane-dense slab
        ),
        compiler_params=pltpu.CompilerParams(
            dimension_semantics=("arbitrary",),
            vmem_limit_bytes=32 * 1024 * 1024),
    )(x2d, W1cat, B1cat, W2bd, B2cat, ew1_slab, eb1_slab, ew2_slab, eb2_slab)

    # glue: split slab back to (n_modes, B, N, N) and extract triu(k=1) (384 floats, cheap)
    edge_4d = jnp.transpose(edge_slab.reshape(N, n_modes, B, N), (1, 2, 0, 3))  # (nm,B,N,N)
    iu, ju = jnp.triu_indices(N, k=1)
    U = jnp.take(edge_4d.reshape(n_modes, B, N * N), iu * N + ju, axis=-1)      # (nm,B,E)
    return jnp.transpose(U, (1, 2, 0))                                          # (B,E,nm)


# ------------------------- deterministic parameters ------------------------ #
def init_params(key, n_modes, T, H1, L, EH):
    ks = jax.random.split(key, 8)

    def u(k, shape, fan_in):
        bound = 1.0 / jnp.sqrt(float(fan_in))
        return jax.random.uniform(k, shape, jnp.float32, -bound, bound)

    W1 = u(ks[0], (n_modes, T, H1), T)         # node_func layer 1
    B1 = u(ks[1], (n_modes, H1), T)
    W2 = u(ks[2], (n_modes, H1, L), H1)        # node_func layer 2
    B2 = u(ks[3], (n_modes, L), H1)
    EW1 = u(ks[4], (n_modes, EH), 1)           # edge_func layer 1 (in=1)
    EB1 = u(ks[5], (n_modes, EH), 1)
    EW2 = u(ks[6], (n_modes, EH), EH)          # edge_func layer 2 (out=1), stored flat
    EB2 = u(ks[7], (n_modes,), EH)
    return (W1, B1, W2, B2, EW1, EB1, EW2, EB2)


# ----------------------------- pure-JAX reference --------------------------- #
def reference_forward(x, params):
    W1, B1, W2, B2, EW1, EB1, EW2, EB2 = params
    B, N, T = x.shape
    n_modes = W1.shape[0]
    iu, ju = jnp.triu_indices(N, k=1)
    outs = []
    for m in range(n_modes):
        h = jnp.tanh(x @ W1[m] + B1[m][None, None, :])
        y = h @ W2[m] + B2[m][None, None, :]                        # (B, N, L)
        L = y.shape[-1]
        mean = y.mean(-1, keepdims=True)
        a = y - mean
        s = jnp.sqrt(jnp.sum(a * a, -1, keepdims=True) / (L - 1))
        cov = a @ jnp.swapaxes(a, -1, -2) / (L - 1)
        corr = cov / (s @ jnp.swapaxes(s, -1, -2) + EPS)
        corr = corr * (1.0 - jnp.eye(N, dtype=corr.dtype))
        g = corr[:, iu, ju][..., None]                              # (B, E, 1)
        g = jnp.tanh(g * EW1[m][None, None, :] + EB1[m][None, None, :])   # (B, E, EH)
        g = jnp.sum(g * EW2[m][None, None, :], -1) + EB2[m]         # (B, E)
        outs.append(g)
    return jnp.stack(outs, axis=-1)                                 # (B, E, n_modes)


# ----------------------------------- main ----------------------------------- #
if __name__ == "__main__":
    B, N, T = 2, 8, 16            # batch, nodes, time-stamps
    H1, L = 32, 8                 # encoder_width_list = [16, 32, 8]
    EH = 8                        # edge_func_width_list = [1, 8, 1]
    n_modes = 3

    key = jax.random.PRNGKey(0)
    kx, kp = jax.random.split(key)
    x = jax.random.normal(kx, (B, N, T), dtype=jnp.float32)
    params = init_params(kp, n_modes, T, H1, L, EH)

    U = jax.block_until_ready(eigen_function_nn_forward(x, params))
    U_ref = jax.block_until_ready(reference_forward(x, params))

    assert U.shape == (B, N * (N - 1) // 2, n_modes), U.shape
    err = float(jnp.max(jnp.abs(U - U_ref)))
    assert jnp.allclose(U, U_ref, atol=2e-5, rtol=2e-5), err
    print("KERNEL_OK")
</pallas_src>

<mosaic_0001>
module attributes {stable_mosaic.version = 11 : i64} {
  func.func @_eigen_kernel(%arg0: i32, %arg1: memref<16x16xf32, #tpu.memory_space<vmem>>, %arg2: memref<16x96xf32, #tpu.memory_space<vmem>>, %arg3: memref<1x96xf32, #tpu.memory_space<vmem>>, %arg4: memref<96x24xf32, #tpu.memory_space<vmem>>, %arg5: memref<1x24xf32, #tpu.memory_space<vmem>>, %arg6: memref<8x48xf32, #tpu.memory_space<vmem>>, %arg7: memref<8x48xf32, #tpu.memory_space<vmem>>, %arg8: memref<8x48xf32, #tpu.memory_space<vmem>>, %arg9: memref<1x48xf32, #tpu.memory_space<vmem>>, %arg10: memref<8x48xf32, #tpu.memory_space<vmem>>) attributes {dimension_semantics = [#tpu.dimension_semantics<arbitrary>], iteration_bounds = array<i64: 1>, scalar_prefetch = 0 : i64, scratch_operands = 0 : i64, tpu.core_type = #tpu.core_type<tc>, window_params = [{pipeline_mode = #tpu.pipeline_mode<synchronous>, transform_indices = @transform_0, window_bounds = array<i64: 16, 16>}, {pipeline_mode = #tpu.pipeline_mode<synchronous>, transform_indices = @transform_1, window_bounds = array<i64: 16, 96>}, {pipeline_mode = #tpu.pipeline_mode<synchronous>, transform_indices = @transform_2, window_bounds = array<i64: 1, 96>}, {pipeline_mode = #tpu.pipeline_mode<synchronous>, transform_indices = @transform_3, window_bounds = array<i64: 96, 24>}, {pipeline_mode = #tpu.pipeline_mode<synchronous>, transform_indices = @transform_4, window_bounds = array<i64: 1, 24>}, {pipeline_mode = #tpu.pipeline_mode<synchronous>, transform_indices = @transform_5, window_bounds = array<i64: 8, 48>}, {pipeline_mode = #tpu.pipeline_mode<synchronous>, transform_indices = @transform_6, window_bounds = array<i64: 8, 48>}, {pipeline_mode = #tpu.pipeline_mode<synchronous>, transform_indices = @transform_7, window_bounds = array<i64: 8, 48>}, {pipeline_mode = #tpu.pipeline_mode<synchronous>, transform_indices = @transform_8, window_bounds = array<i64: 1, 48>}, {pipeline_mode = #tpu.pipeline_mode<synchronous>, transform_indices = @transform_9, window_bounds = array<i64: 8, 48>}]} {
    %c0 = arith.constant 0 : index
    %c0_0 = arith.constant 0 : index
    %0 = vector.load %arg1[%c0, %c0_0] : memref<16x16xf32, #tpu.memory_space<vmem>>, vector<16x16xf32>
    %c0_1 = arith.constant 0 : index
    %c0_2 = arith.constant 0 : index
    %1 = vector.load %arg2[%c0_1, %c0_2] : memref<16x96xf32, #tpu.memory_space<vmem>>, vector<16x96xf32>
    %cst = arith.constant dense<0.000000e+00> : vector<16x96xf32>
    %2 = tpu.matmul %0, %1, %cst {dimension_numbers = #tpu.dot_dimension_numbers<[1], [0], [0], [1], [0, 0, 1, 1], [], []>} : vector<16x16xf32>, vector<16x96xf32>, vector<16x96xf32> -> vector<16x96xf32>
    %c0_3 = arith.constant 0 : index
    %c0_4 = arith.constant 0 : index
    %3 = vector.load %arg3[%c0_3, %c0_4] : memref<1x96xf32, #tpu.memory_space<vmem>>, vector<1x96xf32>
    %4 = vector.broadcast %3 : vector<1x96xf32> to vector<16x96xf32>
    %5 = arith.addf %2, %4 : vector<16x96xf32>
    %6 = math.tanh %5 : vector<16x96xf32>
    %c0_5 = arith.constant 0 : index
    %c0_6 = arith.constant 0 : index
    %7 = vector.load %arg4[%c0_5, %c0_6] : memref<96x24xf32, #tpu.memory_space<vmem>>, vector<96x24xf32>
    %cst_7 = arith.constant dense<0.000000e+00> : vector<16x24xf32>
    %8 = tpu.matmul %6, %7, %cst_7 {dimension_numbers = #tpu.dot_dimension_numbers<[1], [0], [0], [1], [0, 0, 1, 1], [], []>} : vector<16x96xf32>, vector<96x24xf32>, vector<16x24xf32> -> vector<16x24xf32>
    %c0_8 = arith.constant 0 : index
    %c0_9 = arith.constant 0 : index
    %9 = vector.load %arg5[%c0_8, %c0_9] : memref<1x24xf32, #tpu.memory_space<vmem>>, vector<1x24xf32>
    %10 = vector.broadcast %9 : vector<1x24xf32> to vector<16x24xf32>
    %11 = arith.addf %8, %10 : vector<16x24xf32>
    %12 = vector.extract_strided_slice %11 {offsets = [0, 0], sizes = [16, 8], strides = [1, 1]} : vector<16x24xf32> to vector<16x8xf32>
    %cst_10 = arith.constant dense<0.000000e+00> : vector<16xf32>
    %13 = vector.multi_reduction <add>, %12, %cst_10 [1] : vector<16x8xf32> to vector<16xf32>
    %14 = vector.shape_cast %13 : vector<16xf32> to vector<16x1xf32>
    %cst_11 = arith.constant 8.000000e+00 : f32
    %15 = vector.broadcast %cst_11 : f32 to vector<16x1xf32>
    %16 = arith.divf %14, %15 : vector<16x1xf32>
    %17 = vector.broadcast %16 : vector<16x1xf32> to vector<16x8xf32>
    %18 = arith.subf %12, %17 : vector<16x8xf32>
    %19 = arith.mulf %18, %18 : vector<16x8xf32>
    %cst_12 = arith.constant dense<0.000000e+00> : vector<16xf32>
    %20 = vector.multi_reduction <add>, %19, %cst_12 [1] : vector<16x8xf32> to vector<16xf32>
    %21 = vector.shape_cast %20 : vector<16xf32> to vector<16x1xf32>
    %cst_13 = arith.constant 7.000000e+00 : f32
    %22 = vector.broadcast %cst_13 : f32 to vector<16x1xf32>
    %23 = arith.divf %21, %22 : vector<16x1xf32>
    %24 = math.sqrt %23 : vector<16x1xf32>
    %25 = tpu.transpose %24, [1, 0] : vector<16x1xf32> -> vector<1x16xf32>
    %26 = vector.extract_strided_slice %18 {offsets = [0, 0], sizes = [8, 8], strides = [1, 1]} : vector<16x8xf32> to vector<8x8xf32>
    %cst_14 = arith.constant dense<0.000000e+00> : vector<8x8xf32>
    %27 = tpu.matmul %26, %26, %cst_14 {dimension_numbers = #tpu.dot_dimension_numbers<[1], [1], [0], [0], [0, 0, 1, 0], [], []>} : vector<8x8xf32>, vector<8x8xf32>, vector<8x8xf32> -> vector<8x8xf32>
    %28 = vector.extract_strided_slice %24 {offsets = [0, 0], sizes = [8, 1], strides = [1, 1]} : vector<16x1xf32> to vector<8x1xf32>
    %29 = vector.extract_strided_slice %25 {offsets = [0, 0], sizes = [1, 8], strides = [1, 1]} : vector<1x16xf32> to vector<1x8xf32>
    %30 = vector.broadcast %28 : vector<8x1xf32> to vector<8x8xf32>
    %31 = vector.broadcast %29 : vector<1x8xf32> to vector<8x8xf32>
    %32 = arith.mulf %30, %31 : vector<8x8xf32>
    %33 = vector.extract_strided_slice %18 {offsets = [8, 0], sizes = [8, 8], strides = [1, 1]} : vector<16x8xf32> to vector<8x8xf32>
    %cst_15 = arith.constant dense<0.000000e+00> : vector<8x8xf32>
    %34 = tpu.matmul %33, %33, %cst_15 {dimension_numbers = #tpu.dot_dimension_numbers<[1], [1], [0], [0], [0, 0, 1, 0], [], []>} : vector<8x8xf32>, vector<8x8xf32>, vector<8x8xf32> -> vector<8x8xf32>
    %35 = vector.extract_strided_slice %24 {offsets = [8, 0], sizes = [8, 1], strides = [1, 1]} : vector<16x1xf32> to vector<8x1xf32>
    %36 = vector.extract_strided_slice %25 {offsets = [0, 8], sizes = [1, 8], strides = [1, 1]} : vector<1x16xf32> to vector<1x8xf32>
    %37 = vector.broadcast %35 : vector<8x1xf32> to vector<8x8xf32>
    %38 = vector.broadcast %36 : vector<1x8xf32> to vector<8x8xf32>
    %39 = arith.mulf %37, %38 : vector<8x8xf32>
    %40 = vector.extract_strided_slice %11 {offsets = [0, 8], sizes = [16, 8], strides = [1, 1]} : vector<16x24xf32> to vector<16x8xf32>
    %cst_16 = arith.constant dense<0.000000e+00> : vector<16xf32>
    %41 = vector.multi_reduction <add>, %40, %cst_16 [1] : vector<16x8xf32> to vector<16xf32>
    %42 = vector.shape_cast %41 : vector<16xf32> to vector<16x1xf32>
    %cst_17 = arith.constant 8.000000e+00 : f32
    %43 = vector.broadcast %cst_17 : f32 to vector<16x1xf32>
    %44 = arith.divf %42, %43 : vector<16x1xf32>
    %45 = vector.broadcast %44 : vector<16x1xf32> to vector<16x8xf32>
    %46 = arith.subf %40, %45 : vector<16x8xf32>
    %47 = arith.mulf %46, %46 : vector<16x8xf32>
    %cst_18 = arith.constant dense<0.000000e+00> : vector<16xf32>
    %48 = vector.multi_reduction <add>, %47, %cst_18 [1] : vector<16x8xf32> to vector<16xf32>
    %49 = vector.shape_cast %48 : vector<16xf32> to vector<16x1xf32>
    %cst_19 = arith.constant 7.000000e+00 : f32
    %50 = vector.broadcast %cst_19 : f32 to vector<16x1xf32>
    %51 = arith.divf %49, %50 : vector<16x1xf32>
    %52 = math.sqrt %51 : vector<16x1xf32>
    %53 = tpu.transpose %52, [1, 0] : vector<16x1xf32> -> vector<1x16xf32>
    %54 = vector.extract_strided_slice %46 {offsets = [0, 0], sizes = [8, 8], strides = [1, 1]} : vector<16x8xf32> to vector<8x8xf32>
    %cst_20 = arith.constant dense<0.000000e+00> : vector<8x8xf32>
    %55 = tpu.matmul %54, %54, %cst_20 {dimension_numbers = #tpu.dot_dimension_numbers<[1], [1], [0], [0], [0, 0, 1, 0], [], []>} : vector<8x8xf32>, vector<8x8xf32>, vector<8x8xf32> -> vector<8x8xf32>
    %56 = vector.extract_strided_slice %52 {offsets = [0, 0], sizes = [8, 1], strides = [1, 1]} : vector<16x1xf32> to vector<8x1xf32>
    %57 = vector.extract_strided_slice %53 {offsets = [0, 0], sizes = [1, 8], strides = [1, 1]} : vector<1x16xf32> to vector<1x8xf32>
    %58 = vector.broadcast %56 : vector<8x1xf32> to vector<8x8xf32>
    %59 = vector.broadcast %57 : vector<1x8xf32> to vector<8x8xf32>
    %60 = arith.mulf %58, %59 : vector<8x8xf32>
    %61 = vector.extract_strided_slice %46 {offsets = [8, 0], sizes = [8, 8], strides = [1, 1]} : vector<16x8xf32> to vector<8x8xf32>
    %cst_21 = arith.constant dense<0.000000e+00> : vector<8x8xf32>
    %62 = tpu.matmul %61, %61, %cst_21 {dimension_numbers = #tpu.dot_dimension_numbers<[1], [1], [0], [0], [0, 0, 1, 0], [], []>} : vector<8x8xf32>, vector<8x8xf32>, vector<8x8xf32> -> vector<8x8xf32>
    %63 = vector.extract_strided_slice %52 {offsets = [8, 0], sizes = [8, 1], strides = [1, 1]} : vector<16x1xf32> to vector<8x1xf32>
    %64 = vector.extract_strided_slice %53 {offsets = [0, 8], sizes = [1, 8], strides = [1, 1]} : vector<1x16xf32> to vector<1x8xf32>
    %65 = vector.broadcast %63 : vector<8x1xf32> to vector<8x8xf32>
    %66 = vector.broadcast %64 : vector<1x8xf32> to vector<8x8xf32>
    %67 = arith.mulf %65, %66 : vector<8x8xf32>
    %68 = vector.extract_strided_slice %11 {offsets = [0, 16], sizes = [16, 8], strides = [1, 1]} : vector<16x24xf32> to vector<16x8xf32>
    %cst_22 = arith.constant dense<0.000000e+00> : vector<16xf32>
    %69 = vector.multi_reduction <add>, %68, %cst_22 [1] : vector<16x8xf32> to vector<16xf32>
    %70 = vector.shape_cast %69 : vector<16xf32> to vector<16x1xf32>
    %cst_23 = arith.constant 8.000000e+00 : f32
    %71 = vector.broadcast %cst_23 : f32 to vector<16x1xf32>
    %72 = arith.divf %70, %71 : vector<16x1xf32>
    %73 = vector.broadcast %72 : vector<16x1xf32> to vector<16x8xf32>
    %74 = arith.subf %68, %73 : vector<16x8xf32>
    %75 = arith.mulf %74, %74 : vector<16x8xf32>
    %cst_24 = arith.constant dense<0.000000e+00> : vector<16xf32>
    %76 = vector.multi_reduction <add>, %75, %cst_24 [1] : vector<16x8xf32> to vector<16xf32>
    %77 = vector.shape_cast %76 : vector<16xf32> to vector<16x1xf32>
    %cst_25 = arith.constant 7.000000e+00 : f32
    %78 = vector.broadcast %cst_25 : f32 to vector<16x1xf32>
    %79 = arith.divf %77, %78 : vector<16x1xf32>
    %80 = math.sqrt %79 : vector<16x1xf32>
    %81 = tpu.transpose %80, [1, 0] : vector<16x1xf32> -> vector<1x16xf32>
    %82 = vector.extract_strided_slice %74 {offsets = [0, 0], sizes = [8, 8], strides = [1, 1]} : vector<16x8xf32> to vector<8x8xf32>
    %cst_26 = arith.constant dense<0.000000e+00> : vector<8x8xf32>
    %83 = tpu.matmul %82, %82, %cst_26 {dimension_numbers = #tpu.dot_dimension_numbers<[1], [1], [0], [0], [0, 0, 1, 0], [], []>} : vector<8x8xf32>, vector<8x8xf32>, vector<8x8xf32> -> vector<8x8xf32>
    %84 = vector.extract_strided_slice %80 {offsets = [0, 0], sizes = [8, 1], strides = [1, 1]} : vector<16x1xf32> to vector<8x1xf32>
    %85 = vector.extract_strided_slice %81 {offsets = [0, 0], sizes = [1, 8], strides = [1, 1]} : vector<1x16xf32> to vector<1x8xf32>
    %86 = vector.broadcast %84 : vector<8x1xf32> to vector<8x8xf32>
    %87 = vector.broadcast %85 : vector<1x8xf32> to vector<8x8xf32>
    %88 = arith.mulf %86, %87 : vector<8x8xf32>
    %89 = vector.extract_strided_slice %74 {offsets = [8, 0], sizes = [8, 8], strides = [1, 1]} : vector<16x8xf32> to vector<8x8xf32>
    %cst_27 = arith.constant dense<0.000000e+00> : vector<8x8xf32>
    %90 = tpu.matmul %89, %89, %cst_27 {dimension_numbers = #tpu.dot_dimension_numbers<[1], [1], [0], [0], [0, 0, 1, 0], [], []>} : vector<8x8xf32>, vector<8x8xf32>, vector<8x8xf32> -> vector<8x8xf32>
    %91 = vector.extract_strided_slice %80 {offsets = [8, 0], sizes = [8, 1], strides = [1, 1]} : vector<16x1xf32> to vector<8x1xf32>
    %92 = vector.extract_strided_slice %81 {offsets = [0, 8], sizes = [1, 8], strides = [1, 1]} : vector<1x16xf32> to vector<1x8xf32>
    %93 = vector.broadcast %91 : vector<8x1xf32> to vector<8x8xf32>
    %94 = vector.broadcast %92 : vector<1x8xf32> to vector<8x8xf32>
    %95 = arith.mulf %93, %94 : vector<8x8xf32>
    %96 = tpu.concatenate %27, %34, %55, %62, %83, %90 in 1 : vector<8x8xf32>, vector<8x8xf32>, vector<8x8xf32>, vector<8x8xf32>, vector<8x8xf32>, vector<8x8xf32> -> vector<8x48xf32>
    %cst_28 = arith.constant 7.000000e+00 : f32
    %97 = vector.broadcast %cst_28 : f32 to vector<8x48xf32>
    %98 = arith.divf %96, %97 : vector<8x48xf32>
    %99 = tpu.concatenate %32, %39, %60, %67, %88, %95 in 1 : vector<8x8xf32>, vector<8x8xf32>, vector<8x8xf32>, vector<8x8xf32>, vector<8x8xf32>, vector<8x8xf32> -> vector<8x48xf32>
    %cst_29 = arith.constant 9.99999974E-6 : f32
    %100 = vector.broadcast %cst_29 : f32 to vector<8x48xf32>
    %101 = arith.addf %99, %100 : vector<8x48xf32>
    %102 = tpu.reciprocal %101 : vector<8x48xf32> -> vector<8x48xf32>
    %103 = arith.mulf %98, %102 : vector<8x48xf32>
    %cst_30 = arith.constant 0.000000e+00 : f32
    %104 = vector.broadcast %cst_30 : f32 to vector<8x48xf32>
    %c0_31 = arith.constant 0 : index
    %c0_32 = arith.constant 0 : index
    %105 = vector.load %arg9[%c0_31, %c0_32] : memref<1x48xf32, #tpu.memory_space<vmem>>, vector<1x48xf32>
    %106 = vector.broadcast %105 : vector<1x48xf32> to vector<8x48xf32>
    %107 = arith.addf %104, %106 : vector<8x48xf32>
    %c0_33 = arith.constant 0 : index
    %c0_34 = arith.constant 0 : index
    %108 = vector.load %arg8[%c0_33, %c0_34] : memref<8x48xf32, #tpu.memory_space<vmem>>, vector<1x48xf32>
    %c0_35 = arith.constant 0 : index
    %c0_36 = arith.constant 0 : index
    %109 = vector.load %arg6[%c0_35, %c0_36] : memref<8x48xf32, #tpu.memory_space<vmem>>, vector<1x48xf32>
    %110 = vector.broadcast %109 : vector<1x48xf32> to vector<8x48xf32>
    %111 = arith.mulf %103, %110 : vector<8x48xf32>
    %c0_37 = arith.constant 0 : index
    %c0_38 = arith.constant 0 : index
    %112 = vector.load %arg7[%c0_37, %c0_38] : memref<8x48xf32, #tpu.memory_space<vmem>>, vector<1x48xf32>
    %113 = vector.broadcast %112 : vector<1x48xf32> to vector<8x48xf32>
    %114 = arith.addf %111, %113 : vector<8x48xf32>
    %115 = math.tanh %114 : vector<8x48xf32>
    %116 = vector.broadcast %108 : vector<1x48xf32> to vector<8x48xf32>
    %117 = arith.mulf %116, %115 : vector<8x48xf32>
    %118 = arith.addf %107, %117 : vector<8x48xf32>
    %c1 = arith.constant 1 : index
    %c0_39 = arith.constant 0 : index
    %119 = vector.load %arg8[%c1, %c0_39] : memref<8x48xf32, #tpu.memory_space<vmem>>, vector<1x48xf32>
    %c1_40 = arith.constant 1 : index
    %c0_41 = arith.constant 0 : index
    %120 = vector.load %arg6[%c1_40, %c0_41] : memref<8x48xf32, #tpu.memory_space<vmem>>, vector<1x48xf32>
    %121 = vector.broadcast %120 : vector<1x48xf32> to vector<8x48xf32>
    %122 = arith.mulf %103, %121 : vector<8x48xf32>
    %c1_42 = arith.constant 1 : index
    %c0_43 = arith.constant 0 : index
    %123 = vector.load %arg7[%c1_42, %c0_43] : memref<8x48xf32, #tpu.memory_space<vmem>>, vector<1x48xf32>
    %124 = vector.broadcast %123 : vector<1x48xf32> to vector<8x48xf32>
    %125 = arith.addf %122, %124 : vector<8x48xf32>
    %126 = math.tanh %125 : vector<8x48xf32>
    %127 = vector.broadcast %119 : vector<1x48xf32> to vector<8x48xf32>
    %128 = arith.mulf %127, %126 : vector<8x48xf32>
    %129 = arith.addf %118, %128 : vector<8x48xf32>
    %c2 = arith.constant 2 : index
    %c0_44 = arith.constant 0 : index
    %130 = vector.load %arg8[%c2, %c0_44] : memref<8x48xf32, #tpu.memory_space<vmem>>, vector<1x48xf32>
    %c2_45 = arith.constant 2 : index
    %c0_46 = arith.constant 0 : index
    %131 = vector.load %arg6[%c2_45, %c0_46] : memref<8x48xf32, #tpu.memory_space<vmem>>, vector<1x48xf32>
    %132 = vector.broadcast %131 : vector<1x48xf32> to vector<8x48xf32>
    %133 = arith.mulf %103, %132 : vector<8x48xf32>
    %c2_47 = arith.constant 2 : index
    %c0_48 = arith.constant 0 : index
    %134 = vector.load %arg7[%c2_47, %c0_48] : memref<8x48xf32, #tpu.memory_space<vmem>>, vector<1x48xf32>
    %135 = vector.broadcast %134 : vector<1x48xf32> to vector<8x48xf32>
    %136 = arith.addf %133, %135 : vector<8x48xf32>
    %137 = math.tanh %136 : vector<8x48xf32>
    %138 = vector.broadcast %130 : vector<1x48xf32> to vector<8x48xf32>
    %139 = arith.mulf %138, %137 : vector<8x48xf32>
    %140 = arith.addf %129, %139 : vector<8x48xf32>
    %c3 = arith.constant 3 : index
    %c0_49 = arith.constant 0 : index
    %141 = vector.load %arg8[%c3, %c0_49] : memref<8x48xf32, #tpu.memory_space<vmem>>, vector<1x48xf32>
    %c3_50 = arith.constant 3 : index
    %c0_51 = arith.constant 0 : index
    %142 = vector.load %arg6[%c3_50, %c0_51] : memref<8x48xf32, #tpu.memory_space<vmem>>, vector<1x48xf32>
    %143 = vector.broadcast %142 : vector<1x48xf32> to vector<8x48xf32>
    %144 = arith.mulf %103, %143 : vector<8x48xf32>
    %c3_52 = arith.constant 3 : index
    %c0_53 = arith.constant 0 : index
    %145 = vector.load %arg7[%c3_52, %c0_53] : memref<8x48xf32, #tpu.memory_space<vmem>>, vector<1x48xf32>
    %146 = vector.broadcast %145 : vector<1x48xf32> to vector<8x48xf32>
    %147 = arith.addf %144, %146 : vector<8x48xf32>
    %148 = math.tanh %147 : vector<8x48xf32>
    %149 = vector.broadcast %141 : vector<1x48xf32> to vector<8x48xf32>
    %150 = arith.mulf %149, %148 : vector<8x48xf32>
    %151 = arith.addf %140, %150 : vector<8x48xf32>
    %c4 = arith.constant 4 : index
    %c0_54 = arith.constant 0 : index
    %152 = vector.load %arg8[%c4, %c0_54] : memref<8x48xf32, #tpu.memory_space<vmem>>, vector<1x48xf32>
    %c4_55 = arith.constant 4 : index
    %c0_56 = arith.constant 0 : index
    %153 = vector.load %arg6[%c4_55, %c0_56] : memref<8x48xf32, #tpu.memory_space<vmem>>, vector<1x48xf32>
    %154 = vector.broadcast %153 : vector<1x48xf32> to vector<8x48xf32>
    %155 = arith.mulf %103, %154 : vector<8x48xf32>
    %c4_57 = arith.constant 4 : index
    %c0_58 = arith.constant 0 : index
    %156 = vector.load %arg7[%c4_57, %c0_58] : memref<8x48xf32, #tpu.memory_space<vmem>>, vector<1x48xf32>
    %157 = vector.broadcast %156 : vector<1x48xf32> to vector<8x48xf32>
    %158 = arith.addf %155, %157 : vector<8x48xf32>
    %159 = math.tanh %158 : vector<8x48xf32>
    %160 = vector.broadcast %152 : vector<1x48xf32> to vector<8x48xf32>
    %161 = arith.mulf %160, %159 : vector<8x48xf32>
    %162 = arith.addf %151, %161 : vector<8x48xf32>
    %c5 = arith.constant 5 : index
    %c0_59 = arith.constant 0 : index
    %163 = vector.load %arg8[%c5, %c0_59] : memref<8x48xf32, #tpu.memory_space<vmem>>, vector<1x48xf32>
    %c5_60 = arith.constant 5 : index
    %c0_61 = arith.constant 0 : index
    %164 = vector.load %arg6[%c5_60, %c0_61] : memref<8x48xf32, #tpu.memory_space<vmem>>, vector<1x48xf32>
    %165 = vector.broadcast %164 : vector<1x48xf32> to vector<8x48xf32>
    %166 = arith.mulf %103, %165 : vector<8x48xf32>
    %c5_62 = arith.constant 5 : index
    %c0_63 = arith.constant 0 : index
    %167 = vector.load %arg7[%c5_62, %c0_63] : memref<8x48xf32, #tpu.memory_space<vmem>>, vector<1x48xf32>
    %168 = vector.broadcast %167 : vector<1x48xf32> to vector<8x48xf32>
    %169 = arith.addf %166, %168 : vector<8x48xf32>
    %170 = math.tanh %169 : vector<8x48xf32>
    %171 = vector.broadcast %163 : vector<1x48xf32> to vector<8x48xf32>
    %172 = arith.mulf %171, %170 : vector<8x48xf32>
    %173 = arith.addf %162, %172 : vector<8x48xf32>
    %c6 = arith.constant 6 : index
    %c0_64 = arith.constant 0 : index
    %174 = vector.load %arg8[%c6, %c0_64] : memref<8x48xf32, #tpu.memory_space<vmem>>, vector<1x48xf32>
    %c6_65 = arith.constant 6 : index
    %c0_66 = arith.constant 0 : index
    %175 = vector.load %arg6[%c6_65, %c0_66] : memref<8x48xf32, #tpu.memory_space<vmem>>, vector<1x48xf32>
    %176 = vector.broadcast %175 : vector<1x48xf32> to vector<8x48xf32>
    %177 = arith.mulf %103, %176 : vector<8x48xf32>
    %c6_67 = arith.constant 6 : index
    %c0_68 = arith.constant 0 : index
    %178 = vector.load %arg7[%c6_67, %c0_68] : memref<8x48xf32, #tpu.memory_space<vmem>>, vector<1x48xf32>
    %179 = vector.broadcast %178 : vector<1x48xf32> to vector<8x48xf32>
    %180 = arith.addf %177, %179 : vector<8x48xf32>
    %181 = math.tanh %180 : vector<8x48xf32>
    %182 = vector.broadcast %174 : vector<1x48xf32> to vector<8x48xf32>
    %183 = arith.mulf %182, %181 : vector<8x48xf32>
    %184 = arith.addf %173, %183 : vector<8x48xf32>
    %c7 = arith.constant 7 : index
    %c0_69 = arith.constant 0 : index
    %185 = vector.load %arg8[%c7, %c0_69] : memref<8x48xf32, #tpu.memory_space<vmem>>, vector<1x48xf32>
    %c7_70 = arith.constant 7 : index
    %c0_71 = arith.constant 0 : index
    %186 = vector.load %arg6[%c7_70, %c0_71] : memref<8x48xf32, #tpu.memory_space<vmem>>, vector<1x48xf32>
    %187 = vector.broadcast %186 : vector<1x48xf32> to vector<8x48xf32>
    %188 = arith.mulf %103, %187 : vector<8x48xf32>
    %c7_72 = arith.constant 7 : index
    %c0_73 = arith.constant 0 : index
    %189 = vector.load %arg7[%c7_72, %c0_73] : memref<8x48xf32, #tpu.memory_space<vmem>>, vector<1x48xf32>
    %190 = vector.broadcast %189 : vector<1x48xf32> to vector<8x48xf32>
    %191 = arith.addf %188, %190 : vector<8x48xf32>
    %192 = math.tanh %191 : vector<8x48xf32>
    %193 = vector.broadcast %185 : vector<1x48xf32> to vector<8x48xf32>
    %194 = arith.mulf %193, %192 : vector<8x48xf32>
    %195 = arith.addf %184, %194 : vector<8x48xf32>
    %c0_74 = arith.constant 0 : index
    %c0_75 = arith.constant 0 : index
    %196 = vector.load %arg10[%c0_74, %c0_75] : memref<8x48xf32, #tpu.memory_space<vmem>>, vector<8x48xf32>
    tpu.vector_store %arg10[%c0_74, %c0_75], %195 {strides = array<i32>} : memref<8x48xf32, #tpu.memory_space<vmem>>, vector<8x48xf32>,
    return
  }
  func.func @transform_0(%arg0: i32) -> (i32, i32) {
    %c0_i32 = arith.constant 0 : i32
    %c0_i32_0 = arith.constant 0 : i32
    %c0_i32_1 = arith.constant 0 : i32
    return %c0_i32, %c0_i32_0 : i32, i32
  }
  func.func @transform_1(%arg0: i32) -> (i32, i32) {
    %c0_i32 = arith.constant 0 : i32
    %c0_i32_0 = arith.constant 0 : i32
    %c0_i32_1 = arith.constant 0 : i32
    return %c0_i32, %c0_i32_0 : i32, i32
  }
  func.func @transform_2(%arg0: i32) -> (i32, i32) {
    %c0_i32 = arith.constant 0 : i32
    %c0_i32_0 = arith.constant 0 : i32
    %c0_i32_1 = arith.constant 0 : i32
    return %c0_i32, %c0_i32_0 : i32, i32
  }
  func.func @transform_3(%arg0: i32) -> (i32, i32) {
    %c0_i32 = arith.constant 0 : i32
    %c0_i32_0 = arith.constant 0 : i32
    %c0_i32_1 = arith.constant 0 : i32
    return %c0_i32, %c0_i32_0 : i32, i32
  }
  func.func @transform_4(%arg0: i32) -> (i32, i32) {
    %c0_i32 = arith.constant 0 : i32
    %c0_i32_0 = arith.constant 0 : i32
    %c0_i32_1 = arith.constant 0 : i32
    return %c0_i32, %c0_i32_0 : i32, i32
  }
  func.func @transform_5(%arg0: i32) -> (i32, i32) {
    %c0_i32 = arith.constant 0 : i32
    %c0_i32_0 = arith.constant 0 : i32
    %c0_i32_1 = arith.constant 0 : i32
    return %c0_i32, %c0_i32_0 : i32, i32
  }
  func.func @transform_6(%arg0: i32) -> (i32, i32) {
    %c0_i32 = arith.constant 0 : i32
    %c0_i32_0 = arith.constant 0 : i32
    %c0_i32_1 = arith.constant 0 : i32
    return %c0_i32, %c0_i32_0 : i32, i32
  }
  func.func @transform_7(%arg0: i32) -> (i32, i32) {
    %c0_i32 = arith.constant 0 : i32
    %c0_i32_0 = arith.constant 0 : i32
    %c0_i32_1 = arith.constant 0 : i32
    return %c0_i32, %c0_i32_0 : i32, i32
  }
  func.func @transform_8(%arg0: i32) -> (i32, i32) {
    %c0_i32 = arith.constant 0 : i32
    %c0_i32_0 = arith.constant 0 : i32
    %c0_i32_1 = arith.constant 0 : i32
    return %c0_i32, %c0_i32_0 : i32, i32
  }
  func.func @transform_9(%arg0: i32) -> (i32, i32) {
    %c0_i32 = arith.constant 0 : i32
    %c0_i32_0 = arith.constant 0 : i32
    %c0_i32_1 = arith.constant 0 : i32
    return %c0_i32, %c0_i32_0 : i32, i32
  }
}

</mosaic_0001>

<bundles_post_ra>
// kernel: tpu_custom_call.1
= control target key start
LH: loop header
LB: loop body
LE: loop exit
PB: predicated region body
PF: predicated region fallthrough
CT: control target
= control target key end

     0   :  { %vm41_vm0 = vcmask 130048   ;;  %s1111_s0 = inlined_call_operand.vmem [shape: f32[16,16], index: 0, kind: input, shape index: {}]   ;;  %s1112_s1 = inlined_call_operand.vmem [shape: f32[16,96], index: 1, kind: input, shape index: {}]   ;;  %s1113_s2 = inlined_call_operand.vmem [shape: f32[1,96], index: 2, kind: input, shape index: {}]   ;;  %s1114_s3 = inlined_call_operand.vmem [shape: f32[96,24], index: 3, kind: input, shape index: {}]   ;;  %s1115_s4 = inlined_call_operand.vmem [shape: f32[1,24], index: 4, kind: input, shape index: {}]   ;;  %s1116_s5 = inlined_call_operand.vmem [shape: f32[8,48], index: 5, kind: input, shape index: {}]   ;;  %s1117_s6 = inlined_call_operand.vmem [shape: f32[8,48], index: 6, kind: input, shape index: {}]   ;;  %s1118_s7 = inlined_call_operand.vmem [shape: f32[8,48], index: 7, kind: input, shape index: {}]   ;;  %s1119_s8 = inlined_call_operand.vmem [shape: f32[1,48], index: 8, kind: input, shape index: {}]   ;;  %s1120_s9 = inlined_call_operand.hbm [shape: f32[8,48], index: 9, kind: output, shape index: {}]  }
   0x1   :  { %v36_v0 = vld [vmem:[%s1112_s1 + $0x8] sm:$0xff]  ;;  %v35_v1 = vld [vmem:[%s1112_s1] sm:$0xff]  ;;  %v84_v3 = vld [vmem:[%s1114_s3 + $0x58] sm:$0xff] }
   0x2   :  { %62 = vmatpush.msra.mxu0 %v36_v0  ;;  %v33_v2 = vld [vmem:[%s1111_s0] sm:$0xff]  ;;  %v83_v4 = vld [vmem:[%s1114_s3 + $0x50] sm:$0xff]  ;;  %100 = vmatpush.msra.mxu1 %v84_v3  ;;  %v82_v5 = vld [vmem:[%s1114_s3 + $0x48] sm:$0xff] }
   0x3   :  { %v81_v6 = vld [vmem:[%s1114_s3 + $0x40] sm:$0xff] }
   0x4   :  { %63 = vmatpush.msra.mxu0 %v35_v1  ;;  %101 = vmatpush.msra.mxu1 %v83_v4 }
   0x5   :  { %724 = vmatmul.msk.f32.vlgmr.msra.gmra.mxu0 %vm41_vm0, %v33_v2 }
   0x6   :  { %14 = vsyncpa [#allocation3], 0  ;;  %v80_v7 = vld [vmem:[%s1114_s3 + $0x38] sm:$0xff]  ;;  %102 = vmatpush.msra.mxu1 %v82_v5  ;;  %v34_v8 = vld [vmem:[%s1111_s0 + $0x8] sm:$0xff]  ;;  %vm89_vm1 = vcmask 785408   ;;  %vm119_vm2 = vcmask 64512  }
   0x7   :  { %v79_v9 = vld [vmem:[%s1114_s3 + $0x30] sm:$0xff]  ;;  %v78_v10 = vld [vmem:[%s1114_s3 + $0x28] sm:$0xff]  ;;  %v77_v11 = vld [vmem:[%s1114_s3 + $0x20] sm:$0xff]  ;;  %v844_v30 = vmov 8.0   ;;  %v845_v55 = vmov 7.0   ;;  %s847_s21 = smov 24  }
   0x8   :  { %103 = vmatpush.msra.mxu1 %v81_v6  ;;  %v76_v12 = vld [vmem:[%s1114_s3 + $0x18] sm:$0xff]  ;;  %v75_v13 = vld [vmem:[%s1114_s3 + $0x10] sm:$0xff]  ;;  %v74_v14 = vld [vmem:[%s1114_s3 + $0x8] sm:$0xff]  ;;  %s848_s22 = smov 8   ;;  %s849_s23 = smov 32  }
   0x9   :  { %v73_v15 = vld [vmem:[%s1114_s3] sm:$0xff]  ;;  %s842_s3 = smov 112   ;;  %s850_s24 = smov 40  }
   0xa   :  { %104 = vmatpush.msra.mxu1 %v80_v7  ;;  %v751_v16 = vld [vmem:[%s1113_s2] ss:$0 sm:$0xff]  ;;  %s843_s2 = smov 120  }
   0xb   :  { %v752_v23 = vld [vmem:[%s1115_s4] ss:$0 sm:$0xff]  ;;  %s846_s4 = smov 16  }
   0xc   :  { %105 = vmatpush.msra.mxu1 %v79_v9 }
   0xd   :  { %725 = vmatmul.msk.f32.gmra.mxu0 %vm41_vm0, %v34_v8 }
   0xe   :  { %106 = vmatpush.msra.mxu1 %v78_v10 }
  0x10   :  { %107 = vmatpush.msra.mxu1 %v77_v11 }
  0x12   :  { %108 = vmatpush.msra.mxu1 %v76_v12 }
  0x14   :  { %109 = vmatpush.msra.mxu1 %v75_v13 }
  0x16   :  { %110 = vmatpush.msra.mxu1 %v74_v14 }
  0x18   :  { %111 = vmatpush.msra.mxu1 %v73_v15 }
  0x82   :  { %v65_v17 = vpop.f32.mrf.mxu0 }
  0x83   :  { %v66_v18 = vadd.f32 %v751_v16, %v65_v17 }
  0x85   :  { %778 = vtanh.f32 %v66_v18 }
  0x8a   :  { %v68_v19 = vpop.f32.mrf.mxu0 }
  0x8b   :  { %v779_v20 = vpop.eup %778  ;;  %v69_v21 = vadd.f32 %v751_v16, %v68_v19 }
  0x8c   :  { %726 = vmatmul.msk.f32.vlgmr.msra.gmra.mxu1 %vm89_vm1, %v779_v20 }
  0x8d   :  { %780 = vtanh.f32 %v69_v21 }
  0x8e   :  { %782 = vrcp.f32 %v844_v30 }
  0x8f   :  { %784 = vrcp.f32 %v845_v55 }
  0x93   :  { %v781_v22 = vpop.eup %780 }
  0x94   :  { %727 = vmatmul.msk.f32.gmra.mxu1 %vm89_vm1, %v781_v22  ;;  %v783_v31 = vpop.eup %782 }
  0x95   :  { %v127_v32 = vmul.f32 8.0, %v783_v31  ;;  %vm131_vm3 = vweird.f32 %v783_v31  ;;  %v785_v56 = vpop.eup %784 }
  0x96   :  { %v146_v57 = vmul.f32 7.0, %v785_v56  ;;  %vm150_vm4 = vweird.f32 %v785_v56 }
  0x97   :  { %v128_v33 = vsub.f32 1.0, %v127_v32 }
  0x98   :  { %v147_v62 = vsub.f32 1.0, %v146_v57 }
  0x99   :  { %v129_v34 = vmul.f32 %v783_v31, %v128_v33 }
  0x9a   :  { %v148_v1 = vmul.f32 %v785_v56, %v147_v62 }
  0x9b   :  { %v130_v35 = vadd.f32 %v783_v31, %v129_v34 }
  0x9c   :  { %v149_v5 = vadd.f32 %v785_v56, %v148_v1 }
  0x9d   :  { %v132_v38 = vsel %vm131_vm3, %v783_v31, %v130_v35  ;;  %vm569_vm3 = vcmask 195584  }
  0x9e   :  { %v985_v10 = vsel %vm150_vm4, %v785_v56, %v149_v5  ;;  %vm573_vm4 = vcmask 326656  }
 0x109   :  { %v113_v24 = vpop.f32.mrf.mxu1 }
 0x10a   :  { %v114_v25 = vadd.f32 %v752_v23, %v113_v24 }
 0x10c   :  { %404 = vrot.lane.b32.xlu1 %v114_v25, %s842_s3  ;;  %261 = vrot.lane.b32.xlu0 %v114_v25, %s843_s2  ;;  %v120_v26 = vsel %vm119_vm2, %v114_v25, 0.0 }
 0x10d   :  { %121 = vadd.xlane.f32.xlu2 %v120_v26 }
 0x111   :  { %v116_v27 = vpop.f32.mrf.mxu1 }
 0x112   :  { %v961_v28 = vadd.f32 %v752_v23, %v116_v27 }
 0x114   :  { %406 = vrot.lane.b32.xlu1 %v961_v28, %s842_s3  ;;  %263 = vrot.lane.b32.xlu0 %v961_v28, %s843_s2  ;;  %v123_v29 = vsel %vm119_vm2, %v961_v28, 0.0 }
 0x115   :  { %124 = vadd.xlane.f32.xlu2 %v123_v29 }
 0x17e   :  { %v405_v36 = vpop.permute.xlu1 %404  ;;  %v262_v37 = vpop.permute.xlu0 %261 }
 0x17f   :  { %v410_v39 = vsel %vm119_vm2, %v405_v36, 0.0  ;;  %v267_v40 = vsel %vm119_vm2, %v262_v37, 0.0 }
 0x180   :  { %411 = vadd.xlane.f32.xlu1 %v410_v39  ;;  %268 = vadd.xlane.f32.xlu2 %v267_v40  ;;  %v122_v41 = vpop.xlane.xlu2 %121 }
 0x181   :  { %v133_v42 = vmul.f32 %v132_v38, %v122_v41 }
 0x183   :  { %v135_v43 = vsub.f32 %v114_v25, %v133_v42 }
 0x185   :  { %728 = vmatpush.xpose.msk.msra.mxu2 %vm119_vm2, %v135_v43  ;;  %v137_v51 = vmul.f32 %v135_v43, %v135_v43 }
 0x186   :  { %v407_v44 = vpop.permute.xlu1 %406  ;;  %v264_v45 = vpop.permute.xlu0 %263 }
 0x187   :  { %v413_v46 = vsel %vm119_vm2, %v407_v44, 0.0  ;;  %v270_v47 = vsel %vm119_vm2, %v264_v45, 0.0  ;;  %v139_v52 = vsel %vm119_vm2, %v137_v51, 0.0 }
 0x188   :  { %414 = vadd.xlane.f32.xlu0 %v413_v46  ;;  %271 = vadd.xlane.f32.xlu2 %v270_v47  ;;  %v125_v48 = vpop.xlane.xlu2 %124 }
 0x189   :  { %729 = vmatmul.msk.f32.vlgmr.msra.gmra.mxu2 %vm119_vm2, %v135_v43  ;;  %v134_v49 = vmul.f32 %v132_v38, %v125_v48 }
 0x18b   :  { %v136_v50 = vsub.f32 %v961_v28, %v134_v49 }
 0x18d   :  { %730 = vmatpush.xpose.msk.msra.mxu3 %vm119_vm2, %v136_v50  ;;  %v138_v53 = vmul.f32 %v136_v50, %v136_v50 }
 0x18f   :  { %v142_v54 = vsel %vm119_vm2, %v138_v53, 0.0 }
 0x190   :  { %140 = vadd.xlane.f32.xlu2 %v139_v52  ;;  %731 = vmatmul.msk.f32.vlgmr.msra.gmra.mxu3 %vm119_vm2, %v136_v50 }
 0x198   :  { %143 = vadd.xlane.f32.xlu2 %v142_v54 }
 0x1f3   :  { %v412_v58 = vpop.xlane.xlu1 %411  ;;  %v269_v59 = vpop.xlane.xlu2 %268 }
 0x1f4   :  { %v416_v60 = vmul.f32 %v412_v58, %v132_v38  ;;  %v273_v61 = vmul.f32 %v269_v59, %v132_v38 }
 0x1f6   :  { %v418_v63 = vsub.f32 %v114_v25, %v416_v60  ;;  %v275_v0 = vsub.f32 %v114_v25, %v273_v61 }
 0x1f8   :  { %495 = vrot.lane.b32.xlu1 %v418_v63, %s842_s3  ;;  %352 = vrot.lane.b32.xlu0 %v275_v0, %s843_s2  ;;  %v420_v7 = vmul.f32 %v418_v63, %v418_v63  ;;  %v277_v8 = vmul.f32 %v275_v0, %v275_v0 }
 0x1fb   :  { %v415_v2 = vpop.xlane.xlu0 %414  ;;  %v272_v3 = vpop.xlane.xlu2 %271 }
 0x1fc   :  { %v417_v4 = vmul.f32 %v415_v2, %v132_v38  ;;  %v274_v11 = vmul.f32 %v272_v3, %v132_v38 }
 0x1fe   :  { %v419_v6 = vsub.f32 %v961_v28, %v417_v4  ;;  %v276_v14 = vsub.f32 %v961_v28, %v274_v11 }
 0x200   :  { %424 = vrot.lane.b32.xlu1 %v420_v7, %s842_s3  ;;  %281 = vrot.lane.b32.xlu0 %v277_v8, %s843_s2  ;;  %v421_v9 = vmul.f32 %v419_v6, %v419_v6  ;;  %v278_v19 = vmul.f32 %v276_v14, %v276_v14 }
 0x202   :  { %426 = vrot.lane.b32.xlu2 %v421_v9, %s842_s3 }
 0x203   :  { %v141_v12 = vpop.xlane.xlu2 %140 }
 0x204   :  { %v152_v13 = vmul.f32 %v985_v10, %v141_v12 }
 0x206   :  { %786 = vrsqrt.f32 %v152_v13  ;;  %vm161_vm5 = vcmp.eq.f32.partialorder %v152_v13, inf  ;;  %v164_v32 = vand.u32 2147483648, %v152_v13  ;;  %vm163_vm6 = vcmp.eq.f32.partialorder %v152_v13, 0.0 }
 0x208   :  { %522 = vrot.lane.b32.xlu0 %v419_v6, %s842_s3  ;;  %379 = vrot.lane.b32.xlu1 %v276_v14, %s843_s2 }
 0x20b   :  { %v144_v15 = vpop.xlane.xlu2 %143 }
 0x20c   :  { %v787_v16 = vpop.eup %786  ;;  %v153_v17 = vmul.f32 %v985_v10, %v144_v15  ;;  %v1014_v54 = vpop.f32.mrf.mxu2 }
 0x20d   :  { %v155_v18 = vmul.f32 %v787_v16, %v152_v13 }
 0x20e   :  { %788 = vrsqrt.f32 %v153_v17  ;;  %vm173_vm7 = vcmp.eq.f32.partialorder %v153_v17, inf  ;;  %v176_v36 = vand.u32 2147483648, %v153_v17  ;;  %vm175_vm8 = vcmp.eq.f32.partialorder %v153_v17, 0.0 }
 0x20f   :  { %v156_v20 = vmul.f32 %v787_v16, %v155_v18 }
 0x210   :  { %283 = vrot.lane.b32.xlu0 %v278_v19, %s843_s2 }
 0x211   :  { %v157_v22 = vmul.f32 0.5, %v156_v20 }
 0x213   :  { %v158_v24 = vsub.f32 1.5, %v157_v22  ;;  %v255_v7 = vpop.f32.mrf.mxu3 }
 0x214   :  { %v789_v21 = vpop.eup %788 }
 0x215   :  { %v167_v23 = vmul.f32 %v789_v21, %v153_v17  ;;  %v159_v26 = vmul.f32 %v787_v16, %v158_v24 }
 0x217   :  { %v168_v25 = vmul.f32 %v789_v21, %v167_v23  ;;  %v160_v28 = vmul.f32 %v159_v26, %v152_v13 }
 0x219   :  { %v169_v27 = vmul.f32 0.5, %v168_v25  ;;  %v162_v30 = vsel %vm161_vm5, %v152_v13, %v160_v28  ;;  %vm571_vm5 = vcmask 261120  }
 0x21a   :  { %v994_v33 = vsel %vm163_vm6, %v164_v32, %v162_v30 }
 0x21b   :  { %v170_v29 = vsub.f32 1.5, %v169_v27 }
 0x21d   :  { %v171_v31 = vmul.f32 %v789_v21, %v170_v29 }
 0x21f   :  { %v172_v34 = vmul.f32 %v171_v31, %v153_v17 }
 0x221   :  { %v174_v35 = vsel %vm173_vm7, %v153_v17, %v172_v34 }
 0x222   :  { %v997_v37 = vsel %vm175_vm8, %v176_v36, %v174_v35 }
 0x228   :  { %178 = vxpose.xlu2.b32.start [1/2] (short) (narrow) %v994_v33, 8 }
 0x230   :  { %179 = vxpose.xlu2.b32.end [2/2] (short) (narrow) %v997_v37, 8 }
 0x25c   :  { %v427_v44 = vpop.permute.xlu2 %426 }
 0x25d   :  { %v433_v47 = vsel %vm119_vm2, %v427_v44, 0.0 }
 0x26a   :  { %v496_v38 = vpop.permute.xlu1 %495  ;;  %v353_v39 = vpop.permute.xlu0 %352 }
 0x26b   :  { %732 = vmatpush.xpose.msk.msrb.mxu2 %vm119_vm2, %v353_v39  ;;  %736 = vmatpush.xpose.msk.msrb.mxu0 %vm119_vm2, %v496_v38 }
 0x26e   :  { %733 = vmatmul.msk.f32.vlgmr.msrb.gmra.mxu2 %vm119_vm2, %v353_v39  ;;  %737 = vmatmul.msk.f32.vlgmr.msrb.gmra.mxu0 %vm119_vm2, %v496_v38 }
 0x272   :  { %v425_v40 = vpop.permute.xlu1 %424  ;;  %v282_v41 = vpop.permute.xlu0 %281 }
 0x273   :  { %v287_v42 = vsel %vm119_vm2, %v282_v41, 0.0  ;;  %v430_v43 = vsel %vm119_vm2, %v425_v40, 0.0 }
 0x274   :  { %288 = vadd.xlane.f32.xlu1 %v287_v42  ;;  %431 = vadd.xlane.f32.xlu0 %v430_v43 }
 0x27a   :  { %v523_v45 = vpop.permute.xlu0 %522  ;;  %v380_v46 = vpop.permute.xlu1 %379 }
 0x27b   :  { %734 = vmatpush.xpose.msk.msrb.mxu3 %vm119_vm2, %v380_v46  ;;  %738 = vmatpush.xpose.msk.msra.mxu2 %vm119_vm2, %v523_v45 }
 0x27c   :  { %434 = vadd.xlane.f32.xlu0 %v433_v47 }
 0x27e   :  { %735 = vmatmul.msk.f32.vlgmr.msrb.gmra.mxu3 %vm119_vm2, %v380_v46  ;;  %739 = vmatmul.msk.f32.vlgmr.msra.gmra.mxu2 %vm119_vm2, %v523_v45 }
 0x282   :  { %v284_v48 = vpop.permute.xlu0 %283 }
 0x283   :  { %v290_v49 = vsel %vm119_vm2, %v284_v48, 0.0 }
 0x284   :  { %291 = vadd.xlane.f32.xlu1 %v290_v49 }
 0x2e7   :  { %v289_v50 = vpop.xlane.xlu1 %288  ;;  %v432_v51 = vpop.xlane.xlu0 %431 }
 0x2e8   :  { %v293_v52 = vmul.f32 %v289_v50, %v985_v10  ;;  %v436_v53 = vmul.f32 %v432_v51, %v985_v10  ;;  %v194_v51 = vpop.trf.xlu2 }
 0x2ea   :  { %790 = vrsqrt.f32 %v293_v52  ;;  %vm302_vm9 = vcmp.eq.f32.partialorder %v293_v52, inf  ;;  %vm304_vm10 = vcmp.eq.f32.partialorder %v293_v52, 0.0  ;;  %v305_v14 = vand.u32 2147483648, %v293_v52 }
 0x2eb   :  { %792 = vrsqrt.f32 %v436_v53  ;;  %vm445_vm11 = vcmp.eq.f32.partialorder %v436_v53, inf  ;;  %v448_v17 = vand.u32 2147483648, %v436_v53  ;;  %vm447_vm12 = vcmp.eq.f32.partialorder %v436_v53, 0.0  ;;  %v516_v49 = vpop.f32.mrf.mxu0 }
 0x2ef   :  { %v435_v55 = vpop.xlane.xlu0 %434 }
 0x2f0   :  { %v791_v56 = vpop.eup %790  ;;  %v437_v57 = vmul.f32 %v435_v55, %v985_v10 }
 0x2f1   :  { %v793_v58 = vpop.eup %792  ;;  %v373_v59 = vpop.f32.mrf.mxu2  ;;  %v296_v60 = vmul.f32 %v791_v56, %v293_v52 }
 0x2f2   :  { %794 = vrsqrt.f32 %v437_v57  ;;  %552 = vrot.lane.b32.xlu2 %v373_v59, %s846_s4  ;;  %v439_v61 = vmul.f32 %v793_v58, %v436_v53  ;;  %vm457_vm13 = vcmp.eq.f32.partialorder %v437_v57, inf  ;;  %v460_v29 = vand.u32 2147483648, %v437_v57 }
 0x2f3   :  { %v297_v62 = vmul.f32 %v791_v56, %v296_v60  ;;  %vm459_vm14 = vcmp.eq.f32.partialorder %v437_v57, 0.0 }
 0x2f4   :  { %v440_v63 = vmul.f32 %v793_v58, %v439_v61 }
 0x2f5   :  { %v298_v0 = vmul.f32 0.5, %v297_v62 }
 0x2f6   :  { %v441_v1 = vmul.f32 0.5, %v440_v63 }
 0x2f7   :  { %v292_v2 = vpop.xlane.xlu1 %291  ;;  %v299_v3 = vsub.f32 1.5, %v298_v0 }
 0x2f8   :  { %v795_v4 = vpop.eup %794  ;;  %v294_v5 = vmul.f32 %v292_v2, %v985_v10  ;;  %v442_v6 = vsub.f32 1.5, %v441_v1 }
 0x2f9   :  { %v300_v8 = vmul.f32 %v791_v56, %v299_v3  ;;  %v451_v9 = vmul.f32 %v795_v4, %v437_v57 }
 0x2fa   :  { %796 = vrsqrt.f32 %v294_v5  ;;  %v443_v11 = vmul.f32 %v793_v58, %v442_v6  ;;  %vm314_vm15 = vcmp.eq.f32.partialorder %v294_v5, inf  ;;  %v317_v38 = vand.u32 2147483648, %v294_v5 }
 0x2fb   :  { %v301_v12 = vmul.f32 %v300_v8, %v293_v52  ;;  %v452_v13 = vmul.f32 %v795_v4, %v451_v9  ;;  %vm316_vm1 = vcmp.eq.f32.partialorder %v294_v5, 0.0 }
 0x2fc   :  { %v444_v15 = vmul.f32 %v443_v11, %v436_v53 }
 0x2fd   :  { %v303_v16 = vsel %vm302_vm9, %v293_v52, %v301_v12  ;;  %v453_v18 = vmul.f32 0.5, %v452_v13 }
 0x2fe   :  { %v306_v19 = vsel %vm304_vm10, %v305_v14, %v303_v16  ;;  %v446_v20 = vsel %vm445_vm11, %v436_v53, %v444_v15 }
 0x2ff   :  { %319 = vxpose.xlu1.b32.start [1/2] (short) (narrow) %v306_v19, 8  ;;  %v449_v21 = vsel %vm447_vm12, %v448_v17, %v446_v20  ;;  %v454_v22 = vsub.f32 1.5, %v453_v18 }
 0x300   :  { %v797_v23 = vpop.eup %796  ;;  %462 = vxpose.xlu0.b32.start [1/2] (short) (narrow) %v449_v21, 8 }
 0x301   :  { %v400_v24 = vpop.f32.mrf.mxu3  ;;  %v455_v25 = vmul.f32 %v795_v4, %v454_v22  ;;  %v308_v26 = vmul.f32 %v797_v23, %v294_v5  ;;  %v543_v50 = vpop.f32.mrf.mxu2  ;;  %v760_v22 = vld [vmem:[%s1116_s5 + $0x2] ss:$0 sm:$0xff] }
 0x302   :  { %556 = vrot.lane.b32.xlu2 %v400_v24, %s847_s21 }
 0x303   :  { %v456_v27 = vmul.f32 %v455_v25, %v437_v57  ;;  %v309_v28 = vmul.f32 %v797_v23, %v308_v26  ;;  %v755_v25 = vld [vmem:[%s1117_s6] ss:$0 sm:$0xff] }
 0x305   :  { %v458_v30 = vsel %vm457_vm13, %v437_v57, %v456_v27  ;;  %v310_v31 = vmul.f32 0.5, %v309_v28  ;;  %v233_v57 = vperm.slane %v194_v51, 0  ;;  %v758_v27 = vld [vmem:[%s1117_s6 + $0x1] ss:$0 sm:$0xff]  ;;  %v766_v28 = vld [vmem:[%s1116_s5 + $0x4] ss:$0 sm:$0xff] }
 0x306   :  { %v461_v32 = vsel %vm459_vm14, %v460_v29, %v458_v30 }
 0x307   :  { %v311_v34 = vsub.f32 1.5, %v310_v31  ;;  %v234_v58 = vmul.f32 %v233_v57, %v994_v33  ;;  %v258_v59 = vmul.f32 %v233_v57, %v997_v37 }
 0x308   :  { %463 = vxpose.xlu0.b32.end [2/2] (short) (narrow) %v461_v32, 8 }
 0x309   :  { %v312_v35 = vmul.f32 %v797_v23, %v311_v34  ;;  %v592_v62 = vsel %vm119_vm2, %v234_v58, %v258_v59  ;;  %v763_v23 = vld [vmem:[%s1116_s5 + $0x3] ss:$0 sm:$0xff] }
 0x30a   :  { %v764_v34 = vld [vmem:[%s1117_s6 + $0x3] ss:$0 sm:$0xff] }
 0x30b   :  { %v313_v36 = vmul.f32 %v312_v35, %v294_v5  ;;  %v769_v35 = vld [vmem:[%s1116_s5 + $0x5] ss:$0 sm:$0xff] }
 0x30d   :  { %v315_v39 = vsel %vm314_vm15, %v294_v5, %v313_v36 }
 0x30e   :  { %v318_v40 = vsel %vm316_vm1, %v317_v38, %v315_v39 }
 0x30f   :  { %320 = vxpose.xlu1.b32.end [2/2] (short) (narrow) %v318_v40, 8 }
 0x34c   :  { %v553_v52 = vpop.permute.xlu2 %552 }
 0x35c   :  { %v557_v53 = vpop.permute.xlu2 %556 }
 0x376   :  { %548 = vrot.lane.b32.xlu0 %v255_v7, %s848_s22 }
 0x3a4   :  { %v478_v45 = vpop.trf.xlu0 }
 0x3a5   :  { %v519_v46 = vperm.slane %v478_v45, 0  ;;  %v770_v45 = vld [vmem:[%s1117_s6 + $0x5] ss:$0 sm:$0xff] }
 0x3a7   :  { %v520_v47 = vmul.f32 %v519_v46, %v449_v21  ;;  %v546_v48 = vmul.f32 %v519_v46, %v461_v32  ;;  %v775_v46 = vld [vmem:[%s1116_s5 + $0x7] ss:$0 sm:$0xff] }
 0x3ab   :  { %v335_v41 = vpop.trf.xlu1 }
 0x3ac   :  { %v376_v42 = vperm.slane %v335_v41, 0  ;;  %v767_v41 = vld [vmem:[%s1117_s6 + $0x4] ss:$0 sm:$0xff] }
 0x3ae   :  { %v377_v43 = vmul.f32 %v376_v42, %v306_v19  ;;  %v403_v44 = vmul.f32 %v376_v42, %v318_v40  ;;  %v757_v19 = vld [vmem:[%s1116_s5 + $0x1] ss:$0 sm:$0xff]  ;;  %v772_v42 = vld [vmem:[%s1116_s5 + $0x6] ss:$0 sm:$0xff] }
 0x3b0   :  { %577 = vrot.lane.b32.xlu1 %v377_v43, %s846_s4  ;;  %581 = vrot.lane.b32.xlu2 %v403_v44, %s846_s4  ;;  %s851_s4 = smov [#allocation2]  }
 0x3b1   :  { %s713_s21 = sshll.u32 %s851_s4, 4  ;;  %s714_s21 = int_to_ptr.vmem [resolvable:$true] %s713_s21 }
 0x3b8   :  { %585 = vrot.lane.b32.xlu2 %v520_v47, %s849_s23 }
 0x3c0   :  { %589 = vrot.lane.b32.xlu2 %v546_v48, %s849_s23 }
 0x3c8   :  { %560 = vrot.lane.b32.xlu2 %v516_v49, %s849_s23  ;;  %v773_v49 = vld [vmem:[%s1117_s6 + $0x6] ss:$0 sm:$0xff] }
 0x3d0   :  { %564 = vrot.lane.b32.xlu2 %v543_v50, %s850_s24  ;;  %v756_v50 = vld [vmem:[%s1118_s7] ss:$0 sm:$0xff]  ;;  %s715_s24 = sshll.u32 %s1120_s9, 4  ;;  %s716_s24 = int_to_ptr.hbm [resolvable:$true] %s715_s24 }
 0x3e8   :  { %v549_v33 = vpop.permute.xlu0 %548 }
 0x3e9   :  { %v567_v37 = vsel %vm119_vm2, %v1014_v54, %v549_v33  ;;  %v754_v54 = vld [vmem:[%s1116_s5] ss:$0 sm:$0xff]  ;;  %vm706_vm2 = vcmask 392192  }
 0x3ea   :  { %v568_v6 = vsel %vm41_vm0, %v567_v37, %v553_v52  ;;  %v768_v37 = vld [vmem:[%s1118_s7 + $0x4] ss:$0 sm:$0xff] }
 0x3eb   :  { %v570_v11 = vsel %vm569_vm3, %v568_v6, %v557_v53  ;;  %v776_v53 = vld [vmem:[%s1117_s6 + $0x7] ss:$0 sm:$0xff] }
 0x40a   :  { %v582_v55 = vpop.permute.xlu2 %581 }
 0x412   :  { %v586_v56 = vpop.permute.xlu2 %585 }
 0x41a   :  { %v590_v60 = vpop.permute.xlu2 %589 }
 0x422   :  { %v578_v61 = vpop.permute.xlu1 %577  ;;  %v561_v4 = vpop.permute.xlu2 %560 }
 0x423   :  { %v593_v63 = vsel %vm41_vm0, %v592_v62, %v578_v61  ;;  %v572_v13 = vsel %vm571_vm5, %v570_v11, %v561_v4  ;;  %v762_v61 = vld [vmem:[%s1118_s7 + $0x2] ss:$0 sm:$0xff] }
 0x424   :  { %v594_v0 = vsel %vm569_vm3, %v593_v63, %v582_v55  ;;  %v753_v55 = vld [vmem:[%s1119_s8] ss:$0 sm:$0xff] }
 0x425   :  { %v595_v1 = vsel %vm571_vm5, %v594_v0, %v586_v56  ;;  %v759_v56 = vld [vmem:[%s1118_s7 + $0x1] ss:$0 sm:$0xff] }
 0x426   :  { %v596_v2 = vsel %vm573_vm4, %v595_v1, %v590_v60 }
 0x427   :  { %v597_v3 = vadd.f32 1e-05, %v596_v2  ;;  %v765_v2 = vld [vmem:[%s1118_s7 + $0x3] ss:$0 sm:$0xff] }
 0x429   :  { %798 = vrcp.f32 %v597_v3  ;;  %v609_v12 = vand.u32 2147483648, %v597_v3  ;;  %v607_v15 = vand.u32 2147483647, %v597_v3  ;;  %vm603_vm7 = vweird.f32 %v597_v3 }
 0x42a   :  { %v565_v9 = vpop.permute.xlu2 %564 }
 0x42b   :  { %v574_v16 = vsel %vm573_vm4, %v572_v13, %v565_v9  ;;  %v610_v18 = vor.u32 1.1754944e-38, %v609_v12  ;;  %vm608_vm0 = vcmp.eq.f32.partialorder %v607_v15, 8.507059e+37  ;;  %v774_v13 = vld [vmem:[%s1118_s7 + $0x6] ss:$0 sm:$0xff] }
 0x42c   :  { %v575_v21 = vmul.f32 %v574_v16, %v985_v10  ;;  %v761_v10 = vld [vmem:[%s1117_s6 + $0x2] ss:$0 sm:$0xff] }
 0x42f   :  { %v799_v5 = vpop.eup %798 }
 0x430   :  { %v599_v7 = vmul.f32 %v799_v5, %v597_v3  ;;  %vm604_vm6 = vweird.f32 %v799_v5 }
 0x431   :  { %vm605_vm8 = vmor %vm603_vm7, %vm604_vm6 }
 0x432   :  { %v600_v8 = vsub.f32 1.0, %v599_v7 }
 0x434   :  { %v601_v14 = vmul.f32 %v799_v5, %v600_v8  ;;  %v771_v8 = vld [vmem:[%s1118_s7 + $0x5] ss:$0 sm:$0xff] }
 0x436   :  { %v602_v17 = vadd.f32 %v799_v5, %v601_v14 }
 0x438   :  { %v606_v20 = vsel %vm605_vm8, %v799_v5, %v602_v17  ;;  %v777_v17 = vld [vmem:[%s1118_s7 + $0x7] ss:$0 sm:$0xff] }
 0x439   :  { %v611_v24 = vsel %vm608_vm0, %v610_v18, %v606_v20 }
 0x43a   :  { %v612_v26 = vmul.f32 %v611_v24, %v575_v21 }
 0x43c   :  { %v621_v29 = vmul.f32 %v754_v54, %v612_v26  ;;  %v632_v30 = vmul.f32 %v757_v19, %v612_v26  ;;  %v643_v31 = vmul.f32 %v760_v22, %v612_v26  ;;  %v654_v32 = vmul.f32 %v763_v23, %v612_v26 }
 0x43d   :  { %v665_v40 = vmul.f32 %v766_v28, %v612_v26  ;;  %v676_v44 = vmul.f32 %v769_v35, %v612_v26  ;;  %v687_v48 = vmul.f32 %v772_v42, %v612_v26  ;;  %v698_v52 = vmul.f32 %v775_v46, %v612_v26 }
 0x43e   :  { %v624_v36 = vadd.f32 %v755_v25, %v621_v29  ;;  %v635_v38 = vadd.f32 %v758_v27, %v632_v30  ;;  %v646_v39 = vadd.f32 %v761_v10, %v643_v31  ;;  %v657_v43 = vadd.f32 %v764_v34, %v654_v32 }
 0x43f   :  { %v668_v47 = vadd.f32 %v767_v41, %v665_v40  ;;  %v679_v51 = vadd.f32 %v770_v45, %v676_v44  ;;  %v690_v58 = vadd.f32 %v773_v49, %v687_v48  ;;  %v701_v63 = vadd.f32 %v776_v53, %v698_v52 }
 0x440   :  { %800 = vtanh.f32 %v624_v36 }
 0x441   :  { %802 = vtanh.f32 %v635_v38 }
 0x442   :  { %804 = vtanh.f32 %v646_v39 }
 0x443   :  { %806 = vtanh.f32 %v657_v43 }
 0x444   :  { %808 = vtanh.f32 %v668_v47 }
 0x445   :  { %810 = vtanh.f32 %v679_v51 }
 0x446   :  { %v801_v57 = vpop.eup %800  ;;  %812 = vtanh.f32 %v690_v58 }
 0x447   :  { %v803_v59 = vpop.eup %802  ;;  %v627_v60 = vmul.f32 %v801_v57, %v756_v50  ;;  %814 = vtanh.f32 %v701_v63 }
 0x448   :  { %v805_v62 = vpop.eup %804  ;;  %v638_v1 = vmul.f32 %v803_v59, %v759_v56 }
 0x449   :  { %v628_v0 = vadd.f32 %v753_v55, %v627_v60  ;;  %v807_v3 = vpop.eup %806  ;;  %v649_v33 = vmul.f32 %v805_v62, %v762_v61 }
 0x44a   :  { %v809_v5 = vpop.eup %808  ;;  %v660_v7 = vmul.f32 %v807_v3, %v765_v2 }
 0x44b   :  { %v639_v4 = vadd.f32 %v638_v1, %v628_v0  ;;  %v811_v9 = vpop.eup %810  ;;  %v671_v12 = vmul.f32 %v809_v5, %v768_v37 }
 0x44c   :  { %v813_v14 = vpop.eup %812  ;;  %v682_v16 = vmul.f32 %v811_v9, %v771_v8 }
 0x44d   :  { %v650_v6 = vadd.f32 %v649_v33, %v639_v4  ;;  %v815_v18 = vpop.eup %814  ;;  %v693_v19 = vmul.f32 %v813_v14, %v774_v13 }
 0x44e   :  { %v704_v21 = vmul.f32 %v815_v18, %v777_v17 }
 0x44f   :  { %v661_v11 = vadd.f32 %v660_v7, %v650_v6 }
 0x451   :  { %v672_v15 = vadd.f32 %v671_v12, %v661_v11 }
 0x453   :  { %v683_v54 = vadd.f32 %v682_v16, %v672_v15 }
 0x455   :  { %v694_v20 = vadd.f32 %v693_v19, %v683_v54 }
 0x457   :  { %v705_v22 = vadd.f32 %v704_v21, %v694_v20 }
 0x459   :  { %707 = vst.msk [vmem:[#allocation2] sm:$0xff] %vm706_vm2, %v705_v22 }
 0x45a   :  { %718 = dma.vmem_to_hbm [thread:$0]  %s714_s21, 128, %s716_s24, [#allocation3]  }
 0x45b   :  { %840 = dma.done.wait [#allocation3], 128  }
 0x45c   :  { %841 = vsyncadd [#allocation3], 4294967168 }
 0x45d   :  { %723 = vsyncpa [#allocation3], 1 }

</bundles_post_ra>
